<compile_context>
chip_gen: v6e
topology: v6e:2x2x1
jax: 0.10.0
libtpu: 0.0.40
codegen_flags: <defaults>
</compile_context>

<pallas_src>
import math

import jax
import jax.numpy as jnp
from jax.experimental import pallas as pl
from jax.experimental.pallas import tpu as pltpu

# ----- ModelConfig-equivalent hyperparameters (synthetic, deterministic) -----
IN_DIM = 512
H1 = 256            # SleepMlpParam.first_linear[1]
H2 = 128            # SleepMlpParam.second_linear = [256, 128]
NUM_CLASSES = 5     # SleepMlpParam.out_linear = [128, 5]
C_PAD = 8           # classifier padded to 8 columns (sublane quantum)
# Dropout is identity at inference.  # TODO(synk): training-mode dropout not implemented.


def _gelu_tanh(x):
    # tanh-approximate GELU: the transcendental rides the EUP slot instead of a
    # long erf polynomial on the VALU.  Max deviation from torch's exact-erf
    # GELU ~1e-3 -- negligible next to bf16 quantization.
    c = math.sqrt(2.0 / math.pi)
    return 0.5 * x * (1.0 + jnp.tanh(c * (x + 0.044715 * (x * x * x))))


def _gelu_exact(x):
    # torch.nn.GELU() default: 0.5 * x * (1 + erf(x / sqrt(2)))  (reference only)
    return 0.5 * x * (1.0 + jax.lax.erf(x * (1.0 / math.sqrt(2.0))))


def sleep_mlp2_kernel(x_ref, w1_ref, b1_ref, w2_ref, b2_ref, w3_ref, o_ref):
    """One (TM, IN_DIM) row tile through the fused 3-layer MLP.

    x arrives as f32 (no wrapper cast pass); MXU runs bf16 with f32
    accumulation; bias-add + GELU in f32; output is a narrow (TM, C_PAD) f32
    block (cols >= NUM_CLASSES are zero).
    """
    # In-kernel f32 -> bf16 cast: VPU filler, hidden under the input DMA / MXU.
    x = x_ref[...].astype(jnp.bfloat16)                        # (TM, 512)

    # Layer 1: Linear(512 -> 256) + GELU   (Dropout = identity in eval)
    h1 = jnp.dot(x, w1_ref[...], preferred_element_type=jnp.float32)
    h1 = _gelu_tanh(h1 + b1_ref[...])                          # f32, b1 (1, H1)

    # Layer 2: Linear(256 -> 128) + GELU
    h2 = jnp.dot(h1.astype(jnp.bfloat16), w2_ref[...],
                 preferred_element_type=jnp.float32)
    h2 = _gelu_tanh(h2 + b2_ref[...])                          # f32

    # Classifier: Linear(128 -> C_PAD), no bias.
    y = jnp.dot(h2.astype(jnp.bfloat16), w3_ref[...],
                preferred_element_type=jnp.float32)
    o_ref[...] = y.astype(o_ref.dtype)


def _round_up(x, m):
    return ((x + m - 1) // m) * m


def _choose_tm(rows):
    if rows <= 256:
        # Single small tile; multiple of 16 (bf16 sublane packing of h1/h2/x).
        return max(16, _round_up(rows, 16))
    # >= 2 tiles whenever rows > 1024 so the "parallel" axis can shard across
    # v7x's two TensorCores; tiles are multiples of 256 (MXU-friendly) and at
    # most 1024 (~8-9 MiB of VMEM with double-buffering -> comfortable on
    # v7x's 32 MiB scoped limit, ample on v5e/v6e).
    n_tiles = max(pl.cdiv(rows, 1024), 2 if rows > 1024 else 1)
    return min(1024, _round_up(pl.cdiv(rows, n_tiles), 256))


@jax.jit
def sleep_mlp2_forward(x, w1, b1, w2, b2, w3):
    """x: (B, T, 512) float32.  Returns (B, NUM_CLASSES, T) float32."""
    B, T, D = x.shape
    assert D == IN_DIM
    rows = B * T

    TM = _choose_tm(rows)
    grid_m = pl.cdiv(rows, TM)

    # No dtype cast and no explicit padding: x goes to the kernel as f32 and
    # the final partial block (if any) is handled implicitly by Pallas (pad
    # rows are independent garbage whose writes are dropped).
    x2d = x.reshape(rows, D)

    w1b = w1.astype(jnp.bfloat16)
    w2b = w2.astype(jnp.bfloat16)
    # Zero-pad the classifier weight only to 8 output columns.
    w3b = jnp.pad(w3, ((0, 0), (0, C_PAD - NUM_CLASSES))).astype(jnp.bfloat16)

    flops = 2 * grid_m * TM * (IN_DIM * H1 + H1 * H2 + H2 * C_PAD)
    bytes_accessed = (rows * IN_DIM * 4                    # f32 input read
                      + rows * C_PAD * 4                   # narrow f32 output
                      + (IN_DIM * H1 + H1 * H2 + H2 * C_PAD) * 2
                      + (H1 + H2) * 4)

    out2d = pl.pallas_call(
        sleep_mlp2_kernel,
        out_shape=jax.ShapeDtypeStruct((rows, C_PAD), jnp.float32),
        grid_spec=pl.GridSpec(
            grid=(grid_m,),
            in_specs=[
                pl.BlockSpec((TM, IN_DIM), lambda i: (i, 0)),   # pipelined row tile
                pl.BlockSpec((IN_DIM, H1), lambda i: (0, 0)),   # weights: VMEM-resident
                pl.BlockSpec((1, H1), lambda i: (0, 0)),
                pl.BlockSpec((H1, H2), lambda i: (0, 0)),
                pl.BlockSpec((1, H2), lambda i: (0, 0)),
                pl.BlockSpec((H2, C_PAD), lambda i: (0, 0)),
            ],
            out_specs=pl.BlockSpec((TM, C_PAD), lambda i: (i, 0)),
        ),
        compiler_params=pltpu.CompilerParams(
            dimension_semantics=("parallel",),   # rows independent -> megacore
            vmem_limit_bytes=32 * 1024 * 1024,   # above v5e's 16 MiB default
        ),
        cost_estimate=pl.CostEstimate(
            flops=flops,
            transcendentals=rows * (H1 + H2),
            bytes_accessed=bytes_accessed,
        ),
    )(x2d, w1b, b1, w2, b2, w3b)

    out = out2d[:, :NUM_CLASSES].reshape(B, T, NUM_CLASSES)
    # x.permute(0, 2, 1) from the PyTorch forward (tiny 5-wide array now).
    return jnp.transpose(out, (0, 2, 1))


# ----------------------------- init & references -----------------------------
def xavier_uniform(key, fan_in, fan_out):
    """torch.nn.init.xavier_uniform_ for Linear(fan_in -> fan_out), returned in
    (in, out) layout so the kernel computes plain x @ W."""
    bound = math.sqrt(6.0 / (fan_in + fan_out))
    w = jax.random.uniform(key, (fan_out, fan_in), jnp.float32, -bound, bound)
    return w.T


def make_params(seed=0):
    keys = jax.random.split(jax.random.PRNGKey(seed), 5)
    w1 = xavier_uniform(keys[0], IN_DIM, H1)          # (512, 256)
    w2 = xavier_uniform(keys[1], H1, H2)              # (256, 128)
    w3 = xavier_uniform(keys[2], H2, NUM_CLASSES)     # (128, 5)
    # torch default Linear bias init: U(-1/sqrt(fan_in), 1/sqrt(fan_in))
    b1 = jax.random.uniform(keys[3], (1, H1), jnp.float32,
                            -1.0 / math.sqrt(IN_DIM), 1.0 / math.sqrt(IN_DIM))
    b2 = jax.random.uniform(keys[4], (1, H2), jnp.float32,
                            -1.0 / math.sqrt(H1), 1.0 / math.sqrt(H1))
    return w1, b1, w2, b2, w3


def reference_exact(x, w1, b1, w2, b2, w3):
    """f32, exact-erf GELU (torch.nn.GELU() default semantics)."""
    h1 = _gelu_exact(x @ w1 + b1)
    h2 = _gelu_exact(h1 @ w2 + b2)
    return jnp.transpose(h2 @ w3, (0, 2, 1))


def reference_matched(x, w1, b1, w2, b2, w3):
    """Reference using the same bf16 / tanh-GELU numerics as the kernel."""
    xb = x.astype(jnp.bfloat16)
    h1 = _gelu_tanh(jnp.dot(xb, w1.astype(jnp.bfloat16),
                            preferred_element_type=jnp.float32) + b1)
    h2 = _gelu_tanh(jnp.dot(h1.astype(jnp.bfloat16), w2.astype(jnp.bfloat16),
                            preferred_element_type=jnp.float32) + b2)
    y = jnp.dot(h2.astype(jnp.bfloat16), w3.astype(jnp.bfloat16),
                preferred_element_type=jnp.float32)
    return jnp.transpose(y, (0, 2, 1))


def _check(B, T, key, params):
    x = jax.random.normal(key, (B, T, IN_DIM), jnp.float32)
    out = jax.block_until_ready(sleep_mlp2_forward(x, *params))
    assert out.shape == (B, NUM_CLASSES, T), out.shape
    assert bool(jnp.all(jnp.isfinite(out)))

    # Same bf16 / tanh-GELU numerics: bf16 rounding differences compound across
    # three layers, so a few 1e-2 of absolute slack is the realistic floor.
    err_m = float(jnp.max(jnp.abs(out - reference_matched(x, *params))))
    assert err_m < 1e-1, f"matched-ref err {err_m}"

    # torch f32 / exact-erf semantics: bf16 quantization + tanh-GELU approx only.
    err_e = float(jnp.max(jnp.abs(out - reference_exact(x, *params))))
    assert err_e < 2e-1, f"exact-ref err {err_e}"


if __name__ == "__main__":
    params = make_params(seed=0)
    k1, k2 = jax.random.split(jax.random.PRNGKey(0))

    _check(2, 8, k1, params)      # small: single 16-row tile (B*T = 16)
    _check(2, 600, k2, params)    # rows=1200: TM=768, grid=(2,), partial last block

    print("KERNEL_OK")
</pallas_src>

<mosaic_0001>
module attributes {stable_mosaic.version = 11 : i64} {
  func.func @sleep_mlp2_kernel(%arg0: i32, %arg1: memref<16x512xf32, #tpu.memory_space<vmem>>, %arg2: memref<512x256xbf16, #tpu.memory_space<vmem>>, %arg3: memref<1x256xf32, #tpu.memory_space<vmem>>, %arg4: memref<256x128xf32, #tpu.memory_space<vmem>>, %arg5: memref<1x128xf32, #tpu.memory_space<vmem>>, %arg6: memref<128x8xbf16, #tpu.memory_space<vmem>>, %arg7: memref<16x8xf32, #tpu.memory_space<vmem>>) attributes {dimension_semantics = [#tpu.dimension_semantics<parallel>], iteration_bounds = array<i64: 1>, scalar_prefetch = 0 : i64, scratch_operands = 0 : i64, tpu.core_type = #tpu.core_type<tc>, window_params = [{transform_indices = @transform_0, window_bounds = array<i64: 16, 512>}, {pipeline_mode = #tpu.pipeline_mode<synchronous>, transform_indices = @transform_1, window_bounds = array<i64: 512, 256>}, {pipeline_mode = #tpu.pipeline_mode<synchronous>, transform_indices = @transform_2, window_bounds = array<i64: 1, 256>}, {pipeline_mode = #tpu.pipeline_mode<synchronous>, transform_indices = @transform_3, window_bounds = array<i64: 256, 128>}, {pipeline_mode = #tpu.pipeline_mode<synchronous>, transform_indices = @transform_4, window_bounds = array<i64: 1, 128>}, {pipeline_mode = #tpu.pipeline_mode<synchronous>, transform_indices = @transform_5, window_bounds = array<i64: 128, 8>}, {transform_indices = @transform_6, window_bounds = array<i64: 16, 8>}]} {
    %c0 = arith.constant 0 : index
    %c0_0 = arith.constant 0 : index
    %0 = vector.load %arg1[%c0, %c0_0] : memref<16x512xf32, #tpu.memory_space<vmem>>, vector<16x512xf32>
    %1 = arith.truncf %0 : vector<16x512xf32> to vector<16x512xbf16>
    %c0_1 = arith.constant 0 : index
    %c0_2 = arith.constant 0 : index
    %2 = vector.load %arg2[%c0_1, %c0_2] : memref<512x256xbf16, #tpu.memory_space<vmem>>, vector<512x256xbf16>
    %cst = arith.constant dense<0.000000e+00> : vector<16x256xf32>
    %3 = tpu.matmul %1, %2, %cst {dimension_numbers = #tpu.dot_dimension_numbers<[1], [0], [0], [1], [0, 0, 1, 1], [], []>} : vector<16x512xbf16>, vector<512x256xbf16>, vector<16x256xf32> -> vector<16x256xf32>
    %c0_3 = arith.constant 0 : index
    %c0_4 = arith.constant 0 : index
    %4 = vector.load %arg3[%c0_3, %c0_4] : memref<1x256xf32, #tpu.memory_space<vmem>>, vector<1x256xf32>
    %5 = vector.broadcast %4 : vector<1x256xf32> to vector<16x256xf32>
    %6 = arith.addf %3, %5 : vector<16x256xf32>
    %cst_5 = arith.constant 5.000000e-01 : f32
    %7 = vector.broadcast %cst_5 : f32 to vector<16x256xf32>
    %8 = arith.mulf %7, %6 : vector<16x256xf32>
    %9 = arith.mulf %6, %6 : vector<16x256xf32>
    %10 = arith.mulf %9, %6 : vector<16x256xf32>
    %cst_6 = arith.constant 4.471500e-02 : f32
    %11 = vector.broadcast %cst_6 : f32 to vector<16x256xf32>
    %12 = arith.mulf %11, %10 : vector<16x256xf32>
    %13 = arith.addf %6, %12 : vector<16x256xf32>
    %cst_7 = arith.constant 0.797884583 : f32
    %14 = vector.broadcast %cst_7 : f32 to vector<16x256xf32>
    %15 = arith.mulf %14, %13 : vector<16x256xf32>
    %16 = math.tanh %15 : vector<16x256xf32>
    %cst_8 = arith.constant 1.000000e+00 : f32
    %17 = vector.broadcast %cst_8 : f32 to vector<16x256xf32>
    %18 = arith.addf %17, %16 : vector<16x256xf32>
    %19 = arith.mulf %8, %18 : vector<16x256xf32>
    %20 = arith.truncf %19 : vector<16x256xf32> to vector<16x256xbf16>
    %c0_9 = arith.constant 0 : index
    %c0_10 = arith.constant 0 : index
    %21 = vector.load %arg4[%c0_9, %c0_10] : memref<256x128xf32, #tpu.memory_space<vmem>>, vector<256x128xf32>
    %cst_11 = arith.constant dense<0.000000e+00> : vector<16x128xf32>
    %22 = tpu.matmul %20, %21, %cst_11 {dimension_numbers = #tpu.dot_dimension_numbers<[1], [0], [0], [1], [0, 0, 1, 1], [], []>} : vector<16x256xbf16>, vector<256x128xf32>, vector<16x128xf32> -> vector<16x128xf32>
    %c0_12 = arith.constant 0 : index
    %c0_13 = arith.constant 0 : index
    %23 = vector.load %arg5[%c0_12, %c0_13] : memref<1x128xf32, #tpu.memory_space<vmem>>, vector<1x128xf32>
    %24 = vector.broadcast %23 : vector<1x128xf32> to vector<16x128xf32>
    %25 = arith.addf %22, %24 : vector<16x128xf32>
    %cst_14 = arith.constant 5.000000e-01 : f32
    %26 = vector.broadcast %cst_14 : f32 to vector<16x128xf32>
    %27 = arith.mulf %26, %25 : vector<16x128xf32>
    %28 = arith.mulf %25, %25 : vector<16x128xf32>
    %29 = arith.mulf %28, %25 : vector<16x128xf32>
    %cst_15 = arith.constant 4.471500e-02 : f32
    %30 = vector.broadcast %cst_15 : f32 to vector<16x128xf32>
    %31 = arith.mulf %30, %29 : vector<16x128xf32>
    %32 = arith.addf %25, %31 : vector<16x128xf32>
    %cst_16 = arith.constant 0.797884583 : f32
    %33 = vector.broadcast %cst_16 : f32 to vector<16x128xf32>
    %34 = arith.mulf %33, %32 : vector<16x128xf32>
    %35 = math.tanh %34 : vector<16x128xf32>
    %cst_17 = arith.constant 1.000000e+00 : f32
    %36 = vector.broadcast %cst_17 : f32 to vector<16x128xf32>
    %37 = arith.addf %36, %35 : vector<16x128xf32>
    %38 = arith.mulf %27, %37 : vector<16x128xf32>
    %39 = arith.truncf %38 : vector<16x128xf32> to vector<16x128xbf16>
    %c0_18 = arith.constant 0 : index
    %c0_19 = arith.constant 0 : index
    %40 = vector.load %arg6[%c0_18, %c0_19] : memref<128x8xbf16, #tpu.memory_space<vmem>>, vector<128x8xbf16>
    %cst_20 = arith.constant dense<0.000000e+00> : vector<16x8xf32>
    %41 = tpu.matmul %39, %40, %cst_20 {dimension_numbers = #tpu.dot_dimension_numbers<[1], [0], [0], [1], [0, 0, 1, 1], [], []>} : vector<16x128xbf16>, vector<128x8xbf16>, vector<16x8xf32> -> vector<16x8xf32>
    %c0_21 = arith.constant 0 : index
    %c0_22 = arith.constant 0 : index
    %42 = vector.load %arg7[%c0_21, %c0_22] : memref<16x8xf32, #tpu.memory_space<vmem>>, vector<16x8xf32>
    tpu.vector_store %arg7[%c0_21, %c0_22], %41 {strides = array<i32>} : memref<16x8xf32, #tpu.memory_space<vmem>>, vector<16x8xf32>,
    return
  }
  func.func @transform_0(%arg0: i32) -> (i32, i32) {
    %c0_i32 = arith.constant 0 : i32
    %c0_i32_0 = arith.constant 0 : i32
    return %arg0, %c0_i32 : i32, i32
  }
  func.func @transform_1(%arg0: i32) -> (i32, i32) {
    %c0_i32 = arith.constant 0 : i32
    %c0_i32_0 = arith.constant 0 : i32
    %c0_i32_1 = arith.constant 0 : i32
    return %c0_i32, %c0_i32_0 : i32, i32
  }
  func.func @transform_2(%arg0: i32) -> (i32, i32) {
    %c0_i32 = arith.constant 0 : i32
    %c0_i32_0 = arith.constant 0 : i32
    %c0_i32_1 = arith.constant 0 : i32
    return %c0_i32, %c0_i32_0 : i32, i32
  }
  func.func @transform_3(%arg0: i32) -> (i32, i32) {
    %c0_i32 = arith.constant 0 : i32
    %c0_i32_0 = arith.constant 0 : i32
    %c0_i32_1 = arith.constant 0 : i32
    return %c0_i32, %c0_i32_0 : i32, i32
  }
  func.func @transform_4(%arg0: i32) -> (i32, i32) {
    %c0_i32 = arith.constant 0 : i32
    %c0_i32_0 = arith.constant 0 : i32
    %c0_i32_1 = arith.constant 0 : i32
    return %c0_i32, %c0_i32_0 : i32, i32
  }
  func.func @transform_5(%arg0: i32) -> (i32, i32) {
    %c0_i32 = arith.constant 0 : i32
    %c0_i32_0 = arith.constant 0 : i32
    %c0_i32_1 = arith.constant 0 : i32
    return %c0_i32, %c0_i32_0 : i32, i32
  }
  func.func @transform_6(%arg0: i32) -> (i32, i32) {
    %c0_i32 = arith.constant 0 : i32
    %c0_i32_0 = arith.constant 0 : i32
    return %arg0, %c0_i32 : i32, i32
  }
}

</mosaic_0001>

<bundles_post_ra>
// kernel: sleep_mlp2_forward.1
= control target key start
LH: loop header
LB: loop body
LE: loop exit
PB: predicated region body
PF: predicated region fallthrough
CT: control target
= control target key end

     0   :  { %vm1058_vm0 = vmmov 0   ;;  %vm792_vm1 = vcmask 64512   ;;  %s1442_s1 = inlined_call_operand.vmem [shape: bf16[512,256], index: 1, kind: input, shape index: {}]   ;;  %s1443_s0 = inlined_call_operand.vmem [shape: f32[16,512], index: 0, kind: input, shape index: {}]   ;;  %s1444_s3 = inlined_call_operand.vmem [shape: f32[256,128], index: 3, kind: input, shape index: {}]   ;;  %s1445_s2 = inlined_call_operand.vmem [shape: f32[1,256], index: 2, kind: input, shape index: {}]   ;;  %s1446_s5 = inlined_call_operand.vmem [shape: bf16[128,8], index: 5, kind: input, shape index: {}]   ;;  %s1447_s4 = inlined_call_operand.vmem [shape: f32[1,128], index: 4, kind: input, shape index: {}]   ;;  %s1448_s6 = inlined_call_operand.vmem [shape: f32[16,8], index: 6, kind: output, shape index: {}]  }
   0x1   :  { %v941_v0 = vld [vmem:[%s1442_s1 + $0x74] ss:$8 sps:$4 sm:$0xff]   ;;  %v945_v2 = vld [vmem:[%s1442_s1 + $0x70] ss:$8 sps:$4 sm:$0xff]   ;;  %v947_v4 = vld [vmem:[%s1442_s1 + $0x64] ss:$8 sps:$4 sm:$0xff]  }
   0x2   :  { %v943_v1 = vld [vmem:[%s1442_s1 + $0x174] ss:$8 sps:$4 sm:$0xff]   ;;  %432 = vmatprep.subr.bf16.mxu0 %v941_v0  ;;  %v946_v3 = vld [vmem:[%s1442_s1 + $0x170] ss:$8 sps:$4 sm:$0xff]   ;;  %v949_v5 = vld [vmem:[%s1442_s1 + $0x164] ss:$8 sps:$4 sm:$0xff]  }
   0x3   :  { %475 = vmatprep.subr.bf16.mxu1 %v943_v1  ;;  %433 = vmatpush1.bf16.msra.mxu0 %v945_v2  ;;  %v951_v6 = vld [vmem:[%s1442_s1 + $0x60] ss:$8 sps:$4 sm:$0xff]   ;;  %v953_v8 = vld [vmem:[%s1442_s1 + $0x54] ss:$8 sps:$4 sm:$0xff]   ;;  %v957_v10 = vld [vmem:[%s1442_s1 + $0x50] ss:$8 sps:$4 sm:$0xff]  }
   0x4   :  { %476 = vmatpush1.bf16.msra.mxu1 %v946_v3  ;;  %434 = vmatprep.subr.bf16.mxu0 %v947_v4  ;;  %v952_v7 = vld [vmem:[%s1442_s1 + $0x160] ss:$8 sps:$4 sm:$0xff]   ;;  %v955_v9 = vld [vmem:[%s1442_s1 + $0x154] ss:$8 sps:$4 sm:$0xff]   ;;  %v958_v11 = vld [vmem:[%s1442_s1 + $0x150] ss:$8 sps:$4 sm:$0xff]  }
   0x5   :  { %477 = vmatprep.subr.bf16.mxu1 %v949_v5  ;;  %v959_v12 = vld [vmem:[%s1442_s1 + $0x44] ss:$8 sps:$4 sm:$0xff]   ;;  %v963_v14 = vld [vmem:[%s1442_s1 + $0x40] ss:$8 sps:$4 sm:$0xff]   ;;  %v965_v16 = vld [vmem:[%s1442_s1 + $0x34] ss:$8 sps:$4 sm:$0xff]  }
   0x6   :  { %v961_v13 = vld [vmem:[%s1442_s1 + $0x144] ss:$8 sps:$4 sm:$0xff]   ;;  %v964_v15 = vld [vmem:[%s1442_s1 + $0x140] ss:$8 sps:$4 sm:$0xff]   ;;  %v967_v17 = vld [vmem:[%s1442_s1 + $0x134] ss:$8 sps:$4 sm:$0xff]  }
   0x7   :  { %435 = vmatpush1.bf16.msra.mxu0 %v951_v6  ;;  %v969_v18 = vld [vmem:[%s1442_s1 + $0x30] ss:$8 sps:$4 sm:$0xff]   ;;  %v971_v20 = vld [vmem:[%s1442_s1 + $0x24] ss:$8 sps:$4 sm:$0xff]   ;;  %v975_v22 = vld [vmem:[%s1442_s1 + $0x20] ss:$8 sps:$4 sm:$0xff]  }
   0x8   :  { %478 = vmatpush1.bf16.msra.mxu1 %v952_v7  ;;  %436 = vmatprep.subr.bf16.mxu0 %v953_v8  ;;  %v970_v19 = vld [vmem:[%s1442_s1 + $0x130] ss:$8 sps:$4 sm:$0xff]   ;;  %v973_v21 = vld [vmem:[%s1442_s1 + $0x124] ss:$8 sps:$4 sm:$0xff]   ;;  %v976_v23 = vld [vmem:[%s1442_s1 + $0x120] ss:$8 sps:$4 sm:$0xff]  }
   0x9   :  { %479 = vmatprep.subr.bf16.mxu1 %v955_v9  ;;  %v977_v24 = vld [vmem:[%s1442_s1 + $0x14] ss:$8 sps:$4 sm:$0xff]   ;;  %v981_v26 = vld [vmem:[%s1442_s1 + $0x10] ss:$8 sps:$4 sm:$0xff]   ;;  %v983_v28 = vld [vmem:[%s1442_s1 + $0x4] ss:$8 sps:$4 sm:$0xff]  }
   0xa   :  { %v979_v25 = vld [vmem:[%s1442_s1 + $0x114] ss:$8 sps:$4 sm:$0xff]   ;;  %v982_v27 = vld [vmem:[%s1442_s1 + $0x110] ss:$8 sps:$4 sm:$0xff]   ;;  %v985_v29 = vld [vmem:[%s1442_s1 + $0x104] ss:$8 sps:$4 sm:$0xff]  }
   0xb   :  { %437 = vmatpush1.bf16.msra.mxu0 %v957_v10  ;;  %v987_v30 = vld [vmem:[%s1442_s1] ss:$8 sps:$4 sm:$0xff]   ;;  %v989_v32 = vld [vmem:[%s1442_s1 + $0xf4] ss:$8 sps:$4 sm:$0xff]   ;;  %v993_v34 = vld [vmem:[%s1442_s1 + $0xf0] ss:$8 sps:$4 sm:$0xff]  }
   0xc   :  { %480 = vmatpush1.bf16.msra.mxu1 %v958_v11  ;;  %438 = vmatprep.subr.bf16.mxu0 %v959_v12  ;;  %v988_v31 = vld [vmem:[%s1442_s1 + $0x100] ss:$8 sps:$4 sm:$0xff]   ;;  %v991_v33 = vld [vmem:[%s1442_s1 + $0x1f4] ss:$8 sps:$4 sm:$0xff]   ;;  %v994_v35 = vld [vmem:[%s1442_s1 + $0x1f0] ss:$8 sps:$4 sm:$0xff]  }
   0xd   :  { %481 = vmatprep.subr.bf16.mxu1 %v961_v13  ;;  %v995_v36 = vld [vmem:[%s1442_s1 + $0xe4] ss:$8 sps:$4 sm:$0xff]   ;;  %v999_v38 = vld [vmem:[%s1442_s1 + $0xe0] ss:$8 sps:$4 sm:$0xff]   ;;  %v1001_v40 = vld [vmem:[%s1442_s1 + $0xd4] ss:$8 sps:$4 sm:$0xff]  }
   0xe   :  { %v997_v37 = vld [vmem:[%s1442_s1 + $0x1e4] ss:$8 sps:$4 sm:$0xff]   ;;  %v1000_v39 = vld [vmem:[%s1442_s1 + $0x1e0] ss:$8 sps:$4 sm:$0xff]   ;;  %v1003_v41 = vld [vmem:[%s1442_s1 + $0x1d4] ss:$8 sps:$4 sm:$0xff]  }
   0xf   :  { %439 = vmatpush1.bf16.msra.mxu0 %v963_v14  ;;  %v1005_v42 = vld [vmem:[%s1442_s1 + $0xd0] ss:$8 sps:$4 sm:$0xff]   ;;  %v1007_v44 = vld [vmem:[%s1442_s1 + $0xc4] ss:$8 sps:$4 sm:$0xff]   ;;  %v1011_v50 = vld [vmem:[%s1442_s1 + $0xc0] ss:$8 sps:$4 sm:$0xff]  }
  0x10   :  { %482 = vmatpush1.bf16.msra.mxu1 %v964_v15  ;;  %440 = vmatprep.subr.bf16.mxu0 %v965_v16  ;;  %v1006_v43 = vld [vmem:[%s1442_s1 + $0x1d0] ss:$8 sps:$4 sm:$0xff]   ;;  %v1009_v45 = vld [vmem:[%s1442_s1 + $0x1c4] ss:$8 sps:$4 sm:$0xff]   ;;  %v1012_v51 = vld [vmem:[%s1442_s1 + $0x1c0] ss:$8 sps:$4 sm:$0xff]  }
  0x11   :  { %483 = vmatprep.subr.bf16.mxu1 %v967_v17  ;;  %v25_v46 = vld [vmem:[%s1443_s0 + $0x8] sm:$0xff]  ;;  %v27_v48 = vld [vmem:[%s1443_s0 + $0x18] sm:$0xff]  ;;  %v24_v6 = vld [vmem:[%s1443_s0] sm:$0xff] }
  0x12   :  { %v29_v47 = vld [vmem:[%s1443_s0 + $0x28] sm:$0xff]  ;;  %v31_v49 = vld [vmem:[%s1443_s0 + $0x38] sm:$0xff]  ;;  %v28_v7 = vld [vmem:[%s1443_s0 + $0x20] sm:$0xff] }
  0x13   :  { %441 = vmatpush1.bf16.msra.mxu0 %v969_v18  ;;  %v33_v52 = vpack.c.bf16 %v29_v47, %v25_v46  ;;  %v35_v53 = vpack.c.bf16 %v31_v49, %v27_v48  ;;  %v1013_v54 = vld [vmem:[%s1442_s1 + $0xb4] ss:$8 sps:$4 sm:$0xff]   ;;  %v1017_v56 = vld [vmem:[%s1442_s1 + $0xb0] ss:$8 sps:$4 sm:$0xff]   ;;  %v1019_v58 = vld [vmem:[%s1442_s1 + $0xa4] ss:$8 sps:$4 sm:$0xff]   ;;  %v32_v10 = vpack.c.bf16 %v28_v7, %v24_v6 }
  0x14   :  { %484 = vmatpush1.bf16.msra.mxu1 %v970_v19  ;;  %442 = vmatprep.subr.bf16.mxu0 %v971_v20  ;;  %v1015_v55 = vld [vmem:[%s1442_s1 + $0x1b4] ss:$8 sps:$4 sm:$0xff]   ;;  %v1018_v57 = vld [vmem:[%s1442_s1 + $0x1b0] ss:$8 sps:$4 sm:$0xff]   ;;  %v1021_v59 = vld [vmem:[%s1442_s1 + $0x1a4] ss:$8 sps:$4 sm:$0xff]  }
  0x15   :  { %485 = vmatprep.subr.bf16.mxu1 %v973_v21  ;;  %464 = vmatprep.mubr.bf16.mxu0 %v33_v52  ;;  %v1023_v60 = vld [vmem:[%s1442_s1 + $0xa0] ss:$8 sps:$4 sm:$0xff]   ;;  %v1025_v62 = vld [vmem:[%s1442_s1 + $0x94] ss:$8 sps:$4 sm:$0xff]   ;;  %v1029_v0 = vld [vmem:[%s1442_s1 + $0x90] ss:$8 sps:$4 sm:$0xff]  }
  0x16   :  { %507 = vmatprep.mubr.bf16.mxu1 %v35_v53  ;;  %v1024_v61 = vld [vmem:[%s1442_s1 + $0x1a0] ss:$8 sps:$4 sm:$0xff]   ;;  %v1027_v63 = vld [vmem:[%s1442_s1 + $0x194] ss:$8 sps:$4 sm:$0xff]   ;;  %v1030_v1 = vld [vmem:[%s1442_s1 + $0x190] ss:$8 sps:$4 sm:$0xff]  }
  0x17   :  { %443 = vmatpush1.bf16.msra.mxu0 %v975_v22  ;;  %v1031_v2 = vld [vmem:[%s1442_s1 + $0x84] ss:$8 sps:$4 sm:$0xff]   ;;  %v1035_v4 = vld [vmem:[%s1442_s1 + $0x80] ss:$8 sps:$4 sm:$0xff]   ;;  %v26_v8 = vld [vmem:[%s1443_s0 + $0x10] sm:$0xff] }
  0x18   :  { %486 = vmatpush1.bf16.msra.mxu1 %v976_v23  ;;  %444 = vmatprep.subr.bf16.mxu0 %v977_v24  ;;  %v1033_v3 = vld [vmem:[%s1442_s1 + $0x184] ss:$8 sps:$4 sm:$0xff]   ;;  %v1036_v5 = vld [vmem:[%s1442_s1 + $0x180] ss:$8 sps:$4 sm:$0xff]   ;;  %v30_v9 = vld [vmem:[%s1443_s0 + $0x30] sm:$0xff] }
  0x19   :  { %487 = vmatprep.subr.bf16.mxu1 %v979_v25  ;;  %v34_v11 = vpack.c.bf16 %v30_v9, %v26_v8  ;;  %v587_v12 = vld [vmem:[%s1444_s3 + $0xf8] sm:$0xff]  ;;  %v586_v14 = vld [vmem:[%s1444_s3 + $0xf0] sm:$0xff]  ;;  %v585_v16 = vld [vmem:[%s1444_s3 + $0xe8] sm:$0xff] }
  0x1a   :  { %v571_v13 = vld [vmem:[%s1444_s3 + $0x78] sm:$0xff]  ;;  %v570_v15 = vld [vmem:[%s1444_s3 + $0x70] sm:$0xff]  ;;  %v569_v17 = vld [vmem:[%s1444_s3 + $0x68] sm:$0xff] }
  0x1b   :  { %445 = vmatpush1.bf16.msra.mxu0 %v981_v26  ;;  %v584_v18 = vld [vmem:[%s1444_s3 + $0xe0] sm:$0xff]  ;;  %v583_v20 = vld [vmem:[%s1444_s3 + $0xd8] sm:$0xff]  ;;  %v582_v22 = vld [vmem:[%s1444_s3 + $0xd0] sm:$0xff] }
  0x1c   :  { %488 = vmatpush1.bf16.msra.mxu1 %v982_v27  ;;  %446 = vmatprep.subr.bf16.mxu0 %v983_v28  ;;  %v568_v19 = vld [vmem:[%s1444_s3 + $0x60] sm:$0xff]  ;;  %v567_v21 = vld [vmem:[%s1444_s3 + $0x58] sm:$0xff]  ;;  %v566_v23 = vld [vmem:[%s1444_s3 + $0x50] sm:$0xff] }
  0x1d   :  { %489 = vmatprep.subr.bf16.mxu1 %v985_v29  ;;  %v581_v24 = vld [vmem:[%s1444_s3 + $0xc8] sm:$0xff]  ;;  %v580_v26 = vld [vmem:[%s1444_s3 + $0xc0] sm:$0xff]  ;;  %v579_v28 = vld [vmem:[%s1444_s3 + $0xb8] sm:$0xff] }
  0x1e   :  { %v565_v25 = vld [vmem:[%s1444_s3 + $0x48] sm:$0xff]  ;;  %v564_v27 = vld [vmem:[%s1444_s3 + $0x40] sm:$0xff]  ;;  %v563_v29 = vld [vmem:[%s1444_s3 + $0x38] sm:$0xff] }
  0x1f   :  { %447 = vmatpush1.bf16.msra.mxu0 %v987_v30  ;;  %v578_v30 = vld [vmem:[%s1444_s3 + $0xb0] sm:$0xff]  ;;  %v100_v47 = vld [vmem:[%s1445_s2] sm:$0x3] }
  0x20   :  { %490 = vmatpush1.bf16.msra.mxu1 %v988_v31  ;;  %448 = vmatprep.subr.bf16.mxu0 %v989_v32  ;;  %v562_v31 = vld [vmem:[%s1444_s3 + $0x30] sm:$0xff]  ;;  %v577_v32 = vld [vmem:[%s1444_s3 + $0xa8] sm:$0xff] }
  0x21   :  { %491 = vmatprep.subr.bf16.mxu1 %v991_v33  ;;  %v561_v33 = vld [vmem:[%s1444_s3 + $0x28] sm:$0xff] }
  0x23   :  { %449 = vmatpush2.bf16.msra.mxu0 %v993_v34  ;;  %v576_v34 = vld [vmem:[%s1444_s3 + $0xa0] sm:$0xff] }
  0x24   :  { %492 = vmatpush2.bf16.msra.mxu1 %v994_v35  ;;  %450 = vmatprep.subr.bf16.mxu0 %v995_v36  ;;  %v560_v35 = vld [vmem:[%s1444_s3 + $0x20] sm:$0xff]  ;;  %v575_v36 = vld [vmem:[%s1444_s3 + $0x98] sm:$0xff] }
  0x25   :  { %493 = vmatprep.subr.bf16.mxu1 %v997_v37  ;;  %v559_v37 = vld [vmem:[%s1444_s3 + $0x18] sm:$0xff] }
  0x27   :  { %451 = vmatpush2.bf16.msra.mxu0 %v999_v38  ;;  %v574_v38 = vld [vmem:[%s1444_s3 + $0x90] sm:$0xff] }
  0x28   :  { %494 = vmatpush2.bf16.msra.mxu1 %v1000_v39  ;;  %452 = vmatprep.subr.bf16.mxu0 %v1001_v40  ;;  %v558_v39 = vld [vmem:[%s1444_s3 + $0x10] sm:$0xff]  ;;  %v573_v40 = vld [vmem:[%s1444_s3 + $0x88] sm:$0xff] }
  0x29   :  { %495 = vmatprep.subr.bf16.mxu1 %v1003_v41  ;;  %v557_v41 = vld [vmem:[%s1444_s3 + $0x8] sm:$0xff] }
  0x2b   :  { %453 = vmatpush2.bf16.msra.mxu0 %v1005_v42  ;;  %v572_v42 = vld [vmem:[%s1444_s3 + $0x80] sm:$0xff] }
  0x2c   :  { %496 = vmatpush2.bf16.msra.mxu1 %v1006_v43  ;;  %454 = vmatprep.subr.bf16.mxu0 %v1007_v44  ;;  %v556_v43 = vld [vmem:[%s1444_s3] sm:$0xff]  ;;  %v102_v44 = vlaneseq }
  0x2d   :  { %497 = vmatprep.subr.bf16.mxu1 %v1009_v45 }
  0x2e   :  { %v103_v45 = vshrl.u32 %v102_v44, 7  ;;  %v1039_v44 = vld [vmem:[%s1446_s5 + $0x28] sm:$0xff]  }
  0x2f   :  { %455 = vmatpush2.bf16.msra.mxu0 %v1011_v50 }
  0x30   :  { %498 = vmatpush2.bf16.msra.mxu1 %v1012_v51  ;;  %456 = vmatprep.subr.bf16.mxu0 %v1013_v54  ;;  %v104_v46 = vsub.s32 0, %v103_v45  ;;  %v108_v48 = vsub.s32 1, %v103_v45  ;;  %v1040_v45 = vld [vmem:[%s1446_s5 + $0x20] sm:$0xff]  }
  0x31   :  { %499 = vmatprep.subr.bf16.mxu1 %v1015_v55 }
  0x32   :  { %v105_v49 = vrot.slane %v100_v47, %v104_v46  ;;  %v109_v50 = vrot.slane %v100_v47, %v108_v48  ;;  %v1041_v46 = vld [vmem:[%s1446_s5 + $0x18] sm:$0xff]   ;;  %v1042_v47 = vld [vmem:[%s1446_s5 + $0x10] sm:$0xff]   ;;  %v1043_v48 = vld [vmem:[%s1446_s5 + $0x8] sm:$0xff]  }
  0x33   :  { %457 = vmatpush2.bf16.msra.mxu0 %v1017_v56 }
  0x34   :  { %500 = vmatpush2.bf16.msra.mxu1 %v1018_v57  ;;  %458 = vmatprep.subr.bf16.mxu0 %v1019_v58 }
  0x35   :  { %501 = vmatprep.subr.bf16.mxu1 %v1021_v59 }
  0x37   :  { %459 = vmatpush2.bf16.msra.mxu0 %v1023_v60 }
  0x38   :  { %502 = vmatpush2.bf16.msra.mxu1 %v1024_v61  ;;  %460 = vmatprep.subr.bf16.mxu0 %v1025_v62 }
  0x39   :  { %503 = vmatprep.subr.bf16.mxu1 %v1027_v63 }
  0x3b   :  { %461 = vmatpush2.bf16.msra.mxu0 %v1029_v0 }
  0x3c   :  { %504 = vmatpush2.bf16.msra.mxu1 %v1030_v1  ;;  %462 = vmatprep.subr.bf16.mxu0 %v1031_v2 }
  0x3d   :  { %505 = vmatprep.subr.bf16.mxu1 %v1033_v3 }
  0x3f   :  { %463 = vmatpush2.bf16.msra.mxu0 %v1035_v4 }
  0x40   :  { %506 = vmatpush2.bf16.msra.mxu1 %v1036_v5  ;;  %872 = vmatprep.subr.mxu0 %v587_v12 }
  0x42   :  { %465 = vmatmul.mubr.bf16.vlgmr.msra.gmra.mxu0 %v32_v10 }
  0x43   :  { %508 = vmatmul.mubr.bf16.vlgmr.msra.gmra.mxu1 %v34_v11  ;;  %873 = vmatpush3.msra.mxu0 %v571_v13 }
  0x44   :  { %874 = vmatprep.subr.mxu0 %v586_v14 }
  0x45   :  { %875 = vmatpush3.msra.mxu0 %v570_v15 }
  0x46   :  { %876 = vmatprep.subr.mxu0 %v585_v16 }
  0x47   :  { %877 = vmatpush3.msra.mxu0 %v569_v17 }
  0x48   :  { %878 = vmatprep.subr.mxu0 %v584_v18 }
  0x49   :  { %879 = vmatpush3.msra.mxu0 %v568_v19 }
  0x4a   :  { %880 = vmatprep.subr.mxu0 %v583_v20 }
  0x4b   :  { %881 = vmatpush3.msra.mxu0 %v567_v21 }
  0x4c   :  { %882 = vmatprep.subr.mxu0 %v582_v22 }
  0x4d   :  { %883 = vmatpush3.msra.mxu0 %v566_v23 }
  0x4e   :  { %884 = vmatprep.subr.mxu0 %v581_v24 }
  0x4f   :  { %885 = vmatpush3.msra.mxu0 %v565_v25 }
  0x50   :  { %886 = vmatprep.subr.mxu0 %v580_v26 }
  0x51   :  { %887 = vmatpush3.msra.mxu0 %v564_v27 }
  0x52   :  { %888 = vmatprep.subr.mxu0 %v579_v28 }
  0x53   :  { %889 = vmatpush3.msra.mxu0 %v563_v29 }
  0x54   :  { %890 = vmatprep.subr.mxu0 %v578_v30 }
  0x55   :  { %891 = vmatpush3.msra.mxu0 %v562_v31 }
  0x56   :  { %892 = vmatprep.subr.mxu0 %v577_v32 }
  0x57   :  { %893 = vmatpush3.msra.mxu0 %v561_v33 }
  0x58   :  { %894 = vmatprep.subr.mxu0 %v576_v34 }
  0x59   :  { %895 = vmatpush3.msra.mxu0 %v560_v35 }
  0x5a   :  { %896 = vmatprep.subr.mxu0 %v575_v36 }
  0x5b   :  { %897 = vmatpush3.msra.mxu0 %v559_v37 }
  0x5c   :  { %898 = vmatprep.subr.mxu0 %v574_v38 }
  0x5d   :  { %899 = vmatpush3.msra.mxu0 %v558_v39 }
  0x5e   :  { %900 = vmatprep.subr.mxu0 %v573_v40 }
  0x5f   :  { %901 = vmatpush3.msra.mxu0 %v557_v41  ;;  %v1037_v41 = vld [vmem:[%s1446_s5 + $0x38] sm:$0xff]  }
  0x60   :  { %902 = vmatprep.subr.mxu0 %v572_v42  ;;  %v1057_v42 = vmov 0.0  }
  0x61   :  { %903 = vmatpush3.msra.mxu0 %v556_v43  ;;  %919 = vmatprep.subr.bf16.mxu1 %v1057_v42  ;;  %v1038_v43 = vld [vmem:[%s1446_s5 + $0x30] sm:$0xff]  }
  0x62   :  { %920 = vmatpush3.bf16.msra.mxu1 %v1037_v41  ;;  %935 = vmatprep.mubr.msk.bf16.mxu1 %vm1058_vm0, %v1057_v42 }
  0x63   :  { %921 = vmatprep.subr.bf16.mxu1 %v1057_v42 }
  0x66   :  { %922 = vmatpush3.bf16.msra.mxu1 %v1038_v43 }
  0x67   :  { %923 = vmatprep.subr.bf16.mxu1 %v1057_v42 }
  0x6a   :  { %924 = vmatpush3.bf16.msra.mxu1 %v1039_v44 }
  0x6b   :  { %925 = vmatprep.subr.bf16.mxu1 %v1057_v42 }
  0x6e   :  { %926 = vmatpush3.bf16.msra.mxu1 %v1040_v45 }
  0x6f   :  { %927 = vmatprep.subr.bf16.mxu1 %v1057_v42 }
  0x72   :  { %928 = vmatpush3.bf16.msra.mxu1 %v1041_v46 }
  0x73   :  { %929 = vmatprep.subr.bf16.mxu1 %v1057_v42 }
  0x76   :  { %930 = vmatpush3.bf16.msra.mxu1 %v1042_v47 }
  0x77   :  { %931 = vmatprep.subr.bf16.mxu1 %v1057_v42 }
  0x7a   :  { %932 = vmatpush3.bf16.msra.mxu1 %v1043_v48 }
  0x7b   :  { %933 = vmatprep.subr.bf16.mxu1 %v1057_v42 }
 0x102   :  { %v466_v51 = vpop.f32.mrf.mxu0 }
 0x103   :  { %v509_v52 = vpop.f32.mrf.mxu1  ;;  %v467_v53 = vadd.f32 %v466_v51, %v105_v49  ;;  %v863_v51 = vld [vmem:[%s1447_s4] ss:$0 sm:$0xff] }
 0x104   :  { %v468_v54 = vpop.f32.mrf.mxu0 }
 0x105   :  { %v511_v55 = vpop.f32.mrf.mxu1  ;;  %v510_v56 = vadd.f32 %v509_v52, %v467_v53  ;;  %v469_v57 = vadd.f32 %v468_v54, %v109_v50 }
 0x106   :  { %v470_v58 = vpop.f32.mrf.mxu0 }
 0x107   :  { %v522_v59 = vmul.f32 %v510_v56, %v510_v56  ;;  %v512_v60 = vadd.f32 %v511_v55, %v469_v57  ;;  %v471_v61 = vadd.f32 %v470_v58, %v105_v49  ;;  %v513_v62 = vpop.f32.mrf.mxu1  ;;  %v518_v34 = vmul.f32 0.5, %v510_v56  ;;  %v1044_v49 = vld [vmem:[%s1446_s5] sm:$0xff]  }
 0x108   :  { %v472_v63 = vpop.f32.mrf.mxu0  ;;  %934 = vmatpush3.bf16.msra.mxu1 %v1044_v49 }
 0x109   :  { %v526_v0 = vmul.f32 %v522_v59, %v510_v56  ;;  %v523_v1 = vmul.f32 %v512_v60, %v512_v60  ;;  %v514_v2 = vadd.f32 %v513_v62, %v471_v61  ;;  %v473_v3 = vadd.f32 %v472_v63, %v109_v50  ;;  %v515_v7 = vpop.f32.mrf.mxu1 }
 0x10a   :  { %v519_v31 = vmul.f32 0.5, %v512_v60 }
 0x10b   :  { %v530_v4 = vmul.f32 0.044715, %v526_v0  ;;  %v527_v5 = vmul.f32 %v523_v1, %v512_v60  ;;  %v524_v6 = vmul.f32 %v514_v2, %v514_v2  ;;  %v516_v8 = vadd.f32 %v515_v7, %v473_v3 }
 0x10c   :  { %v520_v29 = vmul.f32 0.5, %v514_v2 }
 0x10d   :  { %v534_v9 = vadd.f32 %v530_v4, %v510_v56  ;;  %v531_v10 = vmul.f32 0.044715, %v527_v5  ;;  %v528_v11 = vmul.f32 %v524_v6, %v514_v2  ;;  %v525_v12 = vmul.f32 %v516_v8, %v516_v8 }
 0x10e   :  { %v521_v32 = vmul.f32 0.5, %v516_v8 }
 0x10f   :  { %v538_v13 = vmul.f32 0.7978846, %v534_v9  ;;  %v535_v14 = vadd.f32 %v531_v10, %v512_v60  ;;  %v532_v15 = vmul.f32 0.044715, %v528_v11  ;;  %v529_v16 = vmul.f32 %v525_v12, %v516_v8 }
 0x111   :  { %v539_v17 = vmul.f32 0.7978846, %v535_v14  ;;  %v536_v18 = vadd.f32 %v532_v15, %v514_v2  ;;  %v533_v19 = vmul.f32 0.044715, %v529_v16  ;;  %1045 = vtanh.f32 %v538_v13 }
 0x113   :  { %v540_v20 = vmul.f32 0.7978846, %v536_v18  ;;  %1047 = vtanh.f32 %v539_v17  ;;  %v537_v21 = vadd.f32 %v533_v19, %v516_v8 }
 0x115   :  { %1049 = vtanh.f32 %v540_v20  ;;  %v541_v22 = vmul.f32 0.7978846, %v537_v21 }
 0x117   :  { %1051 = vtanh.f32 %v541_v22 }
 0x11e   :  { %v1046_v23 = vpop.eup %1045 }
 0x11f   :  { %v546_v30 = vadd.f32 1.0, %v1046_v23 }
 0x120   :  { %v1048_v24 = vpop.eup %1047 }
 0x121   :  { %v547_v27 = vadd.f32 1.0, %v1048_v24  ;;  %v550_v38 = vmul.f32 %v546_v30, %v518_v34 }
 0x122   :  { %v1050_v25 = vpop.eup %1049 }
 0x123   :  { %v548_v26 = vadd.f32 1.0, %v1050_v25  ;;  %v551_v36 = vmul.f32 %v547_v27, %v519_v31 }
 0x124   :  { %v1052_v28 = vpop.eup %1051 }
 0x125   :  { %v549_v33 = vadd.f32 1.0, %v1052_v28  ;;  %v552_v35 = vmul.f32 %v548_v26, %v520_v29 }
 0x127   :  { %v553_v37 = vmul.f32 %v549_v33, %v521_v32  ;;  %v554_v40 = vpack.c.bf16 %v552_v35, %v550_v38 }
 0x129   :  { %v555_v39 = vpack.c.bf16 %v553_v37, %v551_v36 }
 0x12b   :  { %659 = vmatprep.mubr.bf16.mxu0 %v555_v39 }
 0x12c   :  { %660 = vmatmul.mubr.bf16.vlgmr.msra.gmra.mxu0 %v554_v40 }
 0x1ec   :  { %v904_v50 = vpop.f32.mrf.mxu0 }
 0x1ee   :  { %v905_v52 = vpop.f32.mrf.mxu0 }
 0x1ef   :  { %v906_v53 = vadd.f32 %v905_v52, %v904_v50 }
 0x1f0   :  { %v907_v54 = vpop.f32.mrf.mxu0 }
 0x1f1   :  { %v662_v55 = vadd.f32 %v906_v53, %v863_v51 }
 0x1f2   :  { %v908_v56 = vpop.f32.mrf.mxu0 }
 0x1f3   :  { %v670_v57 = vmul.f32 %v662_v55, %v662_v55  ;;  %v909_v58 = vadd.f32 %v908_v56, %v907_v54  ;;  %v668_v8 = vmul.f32 0.5, %v662_v55 }
 0x1f5   :  { %v672_v59 = vmul.f32 %v670_v57, %v662_v55  ;;  %v665_v60 = vadd.f32 %v909_v58, %v863_v51 }
 0x1f7   :  { %v674_v61 = vmul.f32 0.044715, %v672_v59  ;;  %v671_v62 = vmul.f32 %v665_v60, %v665_v60  ;;  %v669_v9 = vmul.f32 0.5, %v665_v60 }
 0x1f9   :  { %v676_v63 = vadd.f32 %v674_v61, %v662_v55  ;;  %v673_v0 = vmul.f32 %v671_v62, %v665_v60 }
 0x1fb   :  { %v678_v1 = vmul.f32 0.7978846, %v676_v63  ;;  %v675_v2 = vmul.f32 0.044715, %v673_v0 }
 0x1fd   :  { %1053 = vtanh.f32 %v678_v1  ;;  %v677_v3 = vadd.f32 %v675_v2, %v665_v60 }
 0x1ff   :  { %v679_v4 = vmul.f32 0.7978846, %v677_v3 }
 0x201   :  { %1055 = vtanh.f32 %v679_v4 }
 0x20a   :  { %v1054_v5 = vpop.eup %1053 }
 0x20b   :  { %v682_v6 = vadd.f32 1.0, %v1054_v5 }
 0x20d   :  { %v684_v11 = vmul.f32 %v682_v6, %v668_v8 }
 0x20e   :  { %v1056_v7 = vpop.eup %1055 }
 0x20f   :  { %v683_v10 = vadd.f32 1.0, %v1056_v7 }
 0x211   :  { %v685_v12 = vmul.f32 %v683_v10, %v669_v9 }
 0x213   :  { %v686_v13 = vpack.c.bf16 %v685_v12, %v684_v11 }
 0x215   :  { %936 = vmatmul.mubr.bf16.vlgmr.msra.gmra.mxu1 %v686_v13 }
 0x2d5   :  { %v785_v14 = vpop.f32.mrf.mxu1 }
 0x2d6   :  { %793 = vst.msk [vmem:[%s1448_s6] sm:$0xff] %vm792_vm1, %v785_v14 }
 0x2d7   :  { %v937_v15 = vpop.f32.mrf.mxu1 }
 0x2d9   :  { %v788_v16 = vpop.f32.mrf.mxu1 }
 0x2da   :  { %794 = vst.msk [vmem:[%s1448_s6 + $0x8] sm:$0xff] %vm792_vm1, %v788_v16 }
 0x2db   :  { %v938_v17 = vpop.f32.mrf.mxu1 }

</bundles_post_ra>
